<compile_context>
chip_gen: v7x
topology: tpu7x:2x2x1
jax: 0.10.0
libtpu: 0.0.40
codegen_flags: <defaults>
</compile_context>

<pallas_src>
import functools

import jax
import jax.numpy as jnp
from jax.experimental import pallas as pl
from jax.experimental.pallas import tpu as pltpu


def _identifier_kernel(pooler_ref, lhs_ref, w_ref, b_ref, out_ref,
                       sum_acc, max_acc, *,
                       hidden, seq_len, block_s, inv_s,
                       use_mean, use_max, needs_mask):
    k = pl.program_id(1)

    @pl.when(k == 0)
    def _init():
        sum_acc[...] = jnp.zeros_like(sum_acc)
        max_acc[...] = jnp.full_like(max_acc, -jnp.inf)

    lhs = lhs_ref[...].astype(jnp.float32)                       # [bB, bS, H]

    if needs_mask:
        seq_ids = (k * block_s
                   + jax.lax.broadcasted_iota(jnp.int32, (1, block_s, 1), 1))
        valid = seq_ids < seq_len
    if use_mean:
        contrib = jnp.where(valid, lhs, 0.0) if needs_mask else lhs
        sum_acc[...] += jnp.sum(contrib, axis=1)                 # [bB, H]
    if use_max:
        contrib = jnp.where(valid, lhs, -jnp.inf) if needs_mask else lhs
        max_acc[...] = jnp.maximum(max_acc[...], jnp.max(contrib, axis=1))

    @pl.when(k == pl.num_programs(1) - 1)
    def _finalize():
        pooled = pooler_ref[...].astype(jnp.float32)             # [bB, H]
        # Chunked matmuls instead of concat([pooled, mean, max]) @ W.
        logits = jnp.dot(pooled, w_ref[0:hidden, :],
                         preferred_element_type=jnp.float32)     # [bB, Lp]
        chunk = 1
        if use_mean:
            mean = sum_acc[...] * inv_s
            logits = logits + jnp.dot(
                mean, w_ref[chunk * hidden:(chunk + 1) * hidden, :],
                preferred_element_type=jnp.float32)
            chunk += 1
        if use_max:
            logits = logits + jnp.dot(
                max_acc[...], w_ref[chunk * hidden:(chunk + 1) * hidden, :],
                preferred_element_type=jnp.float32)
        out_ref[...] = logits + b_ref[...]


def _pick_batch_block(b):
    for c in (64, 32, 16, 8):
        if b % c == 0:
            return c
    return b   # full batch (always a legal block)


def _pick_seq_block(s_pad, b_blk, hidden, itemsize, budget=8 * 1024 * 1024):
    # Keep the double-buffered last_hidden_state stream well under scoped VMEM
    # (v7x has only 64 MiB physical / 32 MiB default scoped per TensorCore).
    for c in (512, 256, 128, 64, 32, 16, 8):
        if s_pad % c == 0 and b_blk * c * hidden * itemsize * 2 <= budget:
            return c
    return 8


def identification_head(pooler_output, last_hidden_state, weight_t, bias, *,
                        use_mean_pooling=True, use_max_pooling=True):
    """pooler_output [B,H]; last_hidden_state [B,S,H] (f32 or bf16);
    weight_t [P*H, L] (pre-transposed nn.Linear weight); bias [L] or [1,L]."""
    B, H = pooler_output.shape
    _, S, _ = last_hidden_state.shape
    num_pools = 1 + int(use_mean_pooling) + int(use_max_pooling)
    PH, L = weight_t.shape
    assert PH == num_pools * H, (PH, num_pools, H)

    # Lane-dense output: pad L up to a multiple of 128 (extra columns are zero
    # and sliced off afterwards; the extra MXU columns are free).
    Lp = max(128, ((L + 127) // 128) * 128)
    w_pad = jnp.zeros((PH, Lp), jnp.float32).at[:, :L].set(
        weight_t.astype(jnp.float32))
    b_pad = jnp.zeros((1, Lp), jnp.float32).at[:, :L].set(
        jnp.reshape(bias, (1, L)).astype(jnp.float32))

    # Seq padding + block selection.
    itemsize = last_hidden_state.dtype.itemsize
    S_pad = ((S + 7) // 8) * 8
    bB = _pick_batch_block(B)
    bS = _pick_seq_block(S_pad, bB, H, itemsize)
    needs_mask = S_pad != S
    if needs_mask:
        last_hidden_state = jnp.pad(
            last_hidden_state, ((0, 0), (0, S_pad - S), (0, 0)))

    grid = (B // bB, S_pad // bS)

    kernel = functools.partial(
        _identifier_kernel,
        hidden=H, seq_len=S, block_s=bS, inv_s=float(1.0 / S),
        use_mean=use_mean_pooling, use_max=use_max_pooling,
        needs_mask=needs_mask)

    # Rough VMEM need (double-buffered lhs stream dominates) + headroom,
    # capped so the same code still fits v7x's smaller VMEM.
    pool_itemsize = pooler_output.dtype.itemsize
    vmem_need = (2 * bB * bS * H * itemsize        # lhs double buffer
                 + 2 * bB * H * pool_itemsize      # pooler double buffer
                 + PH * Lp * 4 + Lp * 4            # resident weight + bias
                 + 2 * bB * Lp * 4                 # output buffers
                 + 2 * bB * H * 4)                 # scratch accumulators
    vmem_limit = int(min(max(vmem_need * 2, 16 * 1024 * 1024),
                         48 * 1024 * 1024))

    cost = pl.CostEstimate(
        flops=int(2 * B * PH * Lp + 2 * B * S_pad * H),
        transcendentals=0,
        bytes_accessed=int(B * S_pad * H * itemsize
                           + B * H * pool_itemsize
                           + PH * Lp * 4 + Lp * 4 + B * Lp * 4))

    out = pl.pallas_call(
        kernel,
        out_shape=jax.ShapeDtypeStruct((B, Lp), jnp.float32),
        grid_spec=pltpu.PrefetchScalarGridSpec(
            num_scalar_prefetch=0,
            grid=grid,
            in_specs=[
                pl.BlockSpec((bB, H), lambda i, k: (i, 0)),          # pooler
                pl.BlockSpec((bB, bS, H), lambda i, k: (i, k, 0)),   # lhs stream
                pl.BlockSpec((PH, Lp), lambda i, k: (0, 0)),         # weight (resident)
                pl.BlockSpec((1, Lp), lambda i, k: (0, 0)),          # bias (resident)
            ],
            out_specs=pl.BlockSpec((bB, Lp), lambda i, k: (i, 0)),
            scratch_shapes=[pltpu.VMEM((bB, H), jnp.float32),        # running sum
                            pltpu.VMEM((bB, H), jnp.float32)],       # running max
        ),
        compiler_params=pltpu.CompilerParams(
            dimension_semantics=("parallel", "arbitrary"),
            vmem_limit_bytes=vmem_limit),
        cost_estimate=cost,
    )(pooler_output, last_hidden_state, w_pad, b_pad)

    return out[:, :L]


def reference_head(pooler_output, last_hidden_state, weight_t, bias, *,
                   use_mean_pooling=True, use_max_pooling=True):
    feats = [pooler_output.astype(jnp.float32)]
    lhs = last_hidden_state.astype(jnp.float32)
    if use_mean_pooling:
        feats.append(jnp.mean(lhs, axis=1))
    if use_max_pooling:
        feats.append(jnp.max(lhs, axis=1))
    x = jnp.concatenate(feats, axis=1)
    return (x @ weight_t.astype(jnp.float32)
            + jnp.reshape(bias, (1, -1)).astype(jnp.float32))


if __name__ == "__main__":
    # Small synthetic config consistent with the module's forward.
    B, S, H = 2, 8, 32            # batch, seq, hidden_size
    languages = ["en", "fr", "de", "es"]
    L = len(languages)
    use_mean_pooling = True
    use_max_pooling = True
    num_pools = 1 + use_mean_pooling + use_max_pooling   # = 3

    key = jax.random.PRNGKey(0)
    k1, k2, k3, k4, k5 = jax.random.split(key, 5)

    # Stand-in encoder outputs (the wrapped transformer is external).
    pooler_output = jax.random.normal(k1, (B, H), dtype=jnp.float32)
    last_hidden_state = jax.random.normal(k2, (B, S, H), dtype=jnp.float32)

    # Deterministic identifier (nn.Linear(num_pools*H, L)) parameters,
    # stored pre-transposed: weight_t = W.T with shape [num_pools*H, L].
    weight_t = (jax.random.normal(k3, (num_pools * H, L), dtype=jnp.float32)
                * (1.0 / jnp.sqrt(num_pools * H)))
    bias = jax.random.normal(k4, (1, L), dtype=jnp.float32) * 0.01

    # --- test 1: f32, seq divisible by the block ---------------------------
    out = identification_head(
        pooler_output, last_hidden_state, weight_t, bias,
        use_mean_pooling=use_mean_pooling, use_max_pooling=use_max_pooling)
    out = jax.block_until_ready(out)
    ref = reference_head(
        pooler_output, last_hidden_state, weight_t, bias,
        use_mean_pooling=use_mean_pooling, use_max_pooling=use_max_pooling)
    assert out.shape == (B, L), out.shape
    assert jnp.allclose(out, ref, atol=1e-5, rtol=1e-5), (out, ref)

    # --- test 2: bf16 activations + ragged seq (exercises masking + grid) --
    S2 = 12
    lhs_bf16 = jax.random.normal(k5, (B, S2, H), dtype=jnp.float32).astype(jnp.bfloat16)
    pooled_bf16 = pooler_output.astype(jnp.bfloat16)
    out2 = identification_head(
        pooled_bf16, lhs_bf16, weight_t, bias,
        use_mean_pooling=use_mean_pooling, use_max_pooling=use_max_pooling)
    out2 = jax.block_until_ready(out2)
    ref2 = reference_head(
        pooled_bf16, lhs_bf16, weight_t, bias,
        use_mean_pooling=use_mean_pooling, use_max_pooling=use_max_pooling)
    assert out2.shape == (B, L), out2.shape
    assert jnp.allclose(out2, ref2, atol=2e-2, rtol=2e-2), (out2, ref2)

    print("KERNEL_OK")
</pallas_src>

<mosaic_0001>
module attributes {stable_mosaic.version = 11 : i64} {
  func.func @_identifier_kernel(%arg0: i32, %arg1: i32, %arg2: memref<2x32xf32, #tpu.memory_space<vmem>>, %arg3: memref<2x8x32xf32, #tpu.memory_space<vmem>>, %arg4: memref<96x128xf32, #tpu.memory_space<vmem>>, %arg5: memref<1x128xf32, #tpu.memory_space<vmem>>, %arg6: memref<2x128xf32, #tpu.memory_space<vmem>>, %arg7: memref<2x32xf32, #tpu.memory_space<vmem>>, %arg8: memref<2x32xf32, #tpu.memory_space<vmem>>) attributes {dimension_semantics = [#tpu.dimension_semantics<parallel>, #tpu.dimension_semantics<arbitrary>], iteration_bounds = array<i64: 1, 1>, scalar_prefetch = 0 : i64, scratch_operands = 2 : i64, tpu.core_type = #tpu.core_type<tc>, window_params = [{transform_indices = @transform_0, window_bounds = array<i64: 2, 32>}, {transform_indices = @transform_1, window_bounds = array<i64: 2, 8, 32>}, {pipeline_mode = #tpu.pipeline_mode<synchronous>, transform_indices = @transform_2, window_bounds = array<i64: 96, 128>}, {pipeline_mode = #tpu.pipeline_mode<synchronous>, transform_indices = @transform_3, window_bounds = array<i64: 1, 128>}, {transform_indices = @transform_4, window_bounds = array<i64: 2, 128>}]} {
    %c0_i32 = arith.constant 0 : i32
    %0 = arith.cmpi eq, %arg1, %c0_i32 : i32
    %1 = arith.extui %0 : i1 to i32
    %c0_i32_0 = arith.constant 0 : i32
    %2 = arith.cmpi ne, %1, %c0_i32_0 : i32
    scf.if %2 {
      %cst_14 = arith.constant 0.000000e+00 : f32
      %15 = vector.broadcast %cst_14 : f32 to vector<2x32xf32>
      %c0_15 = arith.constant 0 : index
      %c0_16 = arith.constant 0 : index
      %16 = vector.load %arg7[%c0_15, %c0_16] : memref<2x32xf32, #tpu.memory_space<vmem>>, vector<2x32xf32>
      tpu.vector_store %arg7[%c0_15, %c0_16], %15 {strides = array<i32>} : memref<2x32xf32, #tpu.memory_space<vmem>>, vector<2x32xf32>,
      %cst_17 = arith.constant 0xFF800000 : f32
      %17 = vector.broadcast %cst_17 : f32 to vector<2x32xf32>
      %c0_18 = arith.constant 0 : index
      %c0_19 = arith.constant 0 : index
      %18 = vector.load %arg8[%c0_18, %c0_19] : memref<2x32xf32, #tpu.memory_space<vmem>>, vector<2x32xf32>
      tpu.vector_store %arg8[%c0_18, %c0_19], %17 {strides = array<i32>} : memref<2x32xf32, #tpu.memory_space<vmem>>, vector<2x32xf32>,
    } else {
    }
    %c0 = arith.constant 0 : index
    %c0_1 = arith.constant 0 : index
    %c0_2 = arith.constant 0 : index
    %3 = vector.load %arg3[%c0, %c0_1, %c0_2] : memref<2x8x32xf32, #tpu.memory_space<vmem>>, vector<2x8x32xf32>
    %c0_3 = arith.constant 0 : index
    %c0_4 = arith.constant 0 : index
    %4 = vector.load %arg7[%c0_3, %c0_4] : memref<2x32xf32, #tpu.memory_space<vmem>>, vector<2x32xf32>
    %cst = arith.constant dense<0.000000e+00> : vector<2x32xf32>
    %5 = vector.multi_reduction <add>, %3, %cst [1] : vector<2x8x32xf32> to vector<2x32xf32>
    %6 = arith.addf %4, %5 : vector<2x32xf32>
    %c0_5 = arith.constant 0 : index
    %c0_6 = arith.constant 0 : index
    %7 = vector.load %arg7[%c0_5, %c0_6] : memref<2x32xf32, #tpu.memory_space<vmem>>, vector<2x32xf32>
    tpu.vector_store %arg7[%c0_5, %c0_6], %6 {strides = array<i32>} : memref<2x32xf32, #tpu.memory_space<vmem>>, vector<2x32xf32>,
    %c0_7 = arith.constant 0 : index
    %c0_8 = arith.constant 0 : index
    %8 = vector.load %arg8[%c0_7, %c0_8] : memref<2x32xf32, #tpu.memory_space<vmem>>, vector<2x32xf32>
    %cst_9 = arith.constant dense<0xFF800000> : vector<2x32xf32>
    %9 = vector.multi_reduction <maximumf>, %3, %cst_9 [1] : vector<2x8x32xf32> to vector<2x32xf32>
    %10 = arith.maximumf %8, %9 : vector<2x32xf32>
    %c0_10 = arith.constant 0 : index
    %c0_11 = arith.constant 0 : index
    %11 = vector.load %arg8[%c0_10, %c0_11] : memref<2x32xf32, #tpu.memory_space<vmem>>, vector<2x32xf32>
    tpu.vector_store %arg8[%c0_10, %c0_11], %10 {strides = array<i32>} : memref<2x32xf32, #tpu.memory_space<vmem>>, vector<2x32xf32>,
    %c0_i32_12 = arith.constant 0 : i32
    %12 = arith.cmpi eq, %arg1, %c0_i32_12 : i32
    %13 = arith.extui %12 : i1 to i32
    %c0_i32_13 = arith.constant 0 : i32
    %14 = arith.cmpi ne, %13, %c0_i32_13 : i32
    scf.if %14 {
      %c0_14 = arith.constant 0 : index
      %c0_15 = arith.constant 0 : index
      %15 = vector.load %arg2[%c0_14, %c0_15] : memref<2x32xf32, #tpu.memory_space<vmem>>, vector<2x32xf32>
      %c0_16 = arith.constant 0 : index
      %c0_17 = arith.constant 0 : index
      %16 = vector.load %arg4[%c0_16, %c0_17] : memref<96x128xf32, #tpu.memory_space<vmem>>, vector<32x128xf32>
      %cst_18 = arith.constant dense<0.000000e+00> : vector<2x128xf32>
      %17 = tpu.matmul %15, %16, %cst_18 {dimension_numbers = #tpu.dot_dimension_numbers<[1], [0], [0], [1], [0, 0, 1, 1], [], []>} : vector<2x32xf32>, vector<32x128xf32>, vector<2x128xf32> -> vector<2x128xf32>
      %c0_19 = arith.constant 0 : index
      %c0_20 = arith.constant 0 : index
      %18 = vector.load %arg7[%c0_19, %c0_20] : memref<2x32xf32, #tpu.memory_space<vmem>>, vector<2x32xf32>
      %cst_21 = arith.constant 1.250000e-01 : f32
      %19 = vector.broadcast %cst_21 : f32 to vector<2x32xf32>
      %20 = arith.mulf %18, %19 : vector<2x32xf32>
      %c32 = arith.constant 32 : index
      %c0_22 = arith.constant 0 : index
      %21 = vector.load %arg4[%c32, %c0_22] : memref<96x128xf32, #tpu.memory_space<vmem>>, vector<32x128xf32>
      %cst_23 = arith.constant dense<0.000000e+00> : vector<2x128xf32>
      %22 = tpu.matmul %20, %21, %cst_23 {dimension_numbers = #tpu.dot_dimension_numbers<[1], [0], [0], [1], [0, 0, 1, 1], [], []>} : vector<2x32xf32>, vector<32x128xf32>, vector<2x128xf32> -> vector<2x128xf32>
      %23 = arith.addf %17, %22 : vector<2x128xf32>
      %c0_24 = arith.constant 0 : index
      %c0_25 = arith.constant 0 : index
      %24 = vector.load %arg8[%c0_24, %c0_25] : memref<2x32xf32, #tpu.memory_space<vmem>>, vector<2x32xf32>
      %c64 = arith.constant 64 : index
      %c0_26 = arith.constant 0 : index
      %25 = vector.load %arg4[%c64, %c0_26] : memref<96x128xf32, #tpu.memory_space<vmem>>, vector<32x128xf32>
      %cst_27 = arith.constant dense<0.000000e+00> : vector<2x128xf32>
      %26 = tpu.matmul %24, %25, %cst_27 {dimension_numbers = #tpu.dot_dimension_numbers<[1], [0], [0], [1], [0, 0, 1, 1], [], []>} : vector<2x32xf32>, vector<32x128xf32>, vector<2x128xf32> -> vector<2x128xf32>
      %27 = arith.addf %23, %26 : vector<2x128xf32>
      %c0_28 = arith.constant 0 : index
      %c0_29 = arith.constant 0 : index
      %28 = vector.load %arg5[%c0_28, %c0_29] : memref<1x128xf32, #tpu.memory_space<vmem>>, vector<1x128xf32>
      %29 = vector.broadcast %28 : vector<1x128xf32> to vector<2x128xf32>
      %30 = arith.addf %27, %29 : vector<2x128xf32>
      %c0_30 = arith.constant 0 : index
      %c0_31 = arith.constant 0 : index
      %31 = vector.load %arg6[%c0_30, %c0_31] : memref<2x128xf32, #tpu.memory_space<vmem>>, vector<2x128xf32>
      tpu.vector_store %arg6[%c0_30, %c0_31], %30 {strides = array<i32>} : memref<2x128xf32, #tpu.memory_space<vmem>>, vector<2x128xf32>,
    } else {
    }
    return
  }
  func.func @transform_0(%arg0: i32, %arg1: i32) -> (i32, i32) {
    %c0_i32 = arith.constant 0 : i32
    %c0_i32_0 = arith.constant 0 : i32
    return %arg0, %c0_i32 : i32, i32
  }
  func.func @transform_1(%arg0: i32, %arg1: i32) -> (i32, i32, i32) {
    %c0_i32 = arith.constant 0 : i32
    %c0_i32_0 = arith.constant 0 : i32
    return %arg0, %arg1, %c0_i32 : i32, i32, i32
  }
  func.func @transform_2(%arg0: i32, %arg1: i32) -> (i32, i32) {
    %c0_i32 = arith.constant 0 : i32
    %c0_i32_0 = arith.constant 0 : i32
    %c0_i32_1 = arith.constant 0 : i32
    return %c0_i32, %c0_i32_0 : i32, i32
  }
  func.func @transform_3(%arg0: i32, %arg1: i32) -> (i32, i32) {
    %c0_i32 = arith.constant 0 : i32
    %c0_i32_0 = arith.constant 0 : i32
    %c0_i32_1 = arith.constant 0 : i32
    return %c0_i32, %c0_i32_0 : i32, i32
  }
  func.func @transform_4(%arg0: i32, %arg1: i32) -> (i32, i32) {
    %c0_i32 = arith.constant 0 : i32
    %c0_i32_0 = arith.constant 0 : i32
    return %arg0, %c0_i32 : i32, i32
  }
}

</mosaic_0001>

<bundles_post_ra>
// kernel: tpu_custom_call.1
= control target key start
LH: loop header
LB: loop body
LE: loop exit
PB: predicated region body
PF: predicated region fallthrough
CT: control target
= control target key end

     0   :  { %9 = vsyncpa [#allocation5], 0  ;;  %s665_s0 = inlined_call_operand.hbm [shape: f32[2,32], index: 0, kind: input, shape index: {}]   ;;  %s666_s1 = inlined_call_operand.hbm [shape: f32[2,8,32], index: 1, kind: input, shape index: {}]   ;;  %s667_s2 = inlined_call_operand.hbm [shape: f32[96,128], index: 2, kind: input, shape index: {}]   ;;  %s668_s3 = inlined_call_operand.vmem [shape: f32[1,128], index: 3, kind: input, shape index: {}]   ;;  %s669_s4 = inlined_call_operand.hbm [shape: f32[2,128], index: 4, kind: output, shape index: {}]  }
   0x1   :  { %10 = vsyncpa [#allocation8], 0 }
   0x2   :  { %11 = vsyncpa [#allocation6], 0  ;;  %s549_s15 = smov [#allocation7]   ;;  %s455_s19 = scalar_lea.hbm %s666_s1, 256 }
   0x3   :  { %s27_s16 = sshll.u32 %s549_s15, 4  ;;  %p456_p0 = scmp.ne.s32.totalorder %s666_s1, %s455_s19  ;;  %s28_s16 = int_to_ptr.vmem [resolvable:$true] %s27_s16 }
   0x4   :  { %p459_p1 = scmp.lt.u32.totalorder %s455_s19, %s666_s1 }
   0x6   :  { %p461_p2 = pnand %p459_p1, %p456_p0 }
   0x8   :  { %464 = shalt.err (!%p461_p2)
}
   0x9   :  { %s465_s24 = scalar_lea.vmem %s28_s16, 256  ;;  %p470_p4 = scmp.lt.s32.totalorder %s28_s16, %s28_s16 }
   0xa   :  { %p466_p3 = scmp.ne.s32.totalorder %s28_s16, %s465_s24  ;;  %p471_p5 = scmp.lt.s32.totalorder %s465_s24, %s465_s24 }
   0xc   :  { %p472_p6 = por %p471_p5, %p470_p4 }
   0xe   :  { %p473_p7 = pnand %p472_p6, %p466_p3 }
  0x10   :  { %476 = shalt.err (!%p473_p7)
}
  0x11   :  { %s550_s25 = smov 128   ;;  %s551_s26 = smov 8  }
  0x12   :  { %33 = dma.hbm_to_vmem [thread:$0]  %s666_s1, 256, %s28_s16, [#allocation8], %s550_s25, %s550_s25, %s551_s26  }
  0x13   :  { %s552_s29 = smov [#allocation4]   ;;  %s553_s5 = smov [#allocation9]  }
  0x14   :  { %s18_s30 = sshll.u32 %s552_s29, 4  ;;  %s39_s6 = sshll.u32 %s553_s5, 4  ;;  %s19_s30 = int_to_ptr.vmem [resolvable:$true] %s18_s30  ;;  %s40_s6 = int_to_ptr.vmem [resolvable:$true] %s39_s6 }
  0x15   :  { %s477_s9 = scalar_lea.hbm %s665_s0, 32 }
  0x16   :  { %p478_p8 = scmp.ne.s32.totalorder %s665_s0, %s477_s9  ;;  %p481_p9 = scmp.lt.u32.totalorder %s477_s9, %s665_s0 }
  0x18   :  { %p483_p10 = pnand %p481_p9, %p478_p8 }
  0x1a   :  { %486 = shalt.err (!%p483_p10)
}
  0x1b   :  { %s487_s1 = scalar_lea.vmem %s19_s30, 32  ;;  %p492_p12 = scmp.lt.s32.totalorder %s19_s30, %s19_s30 }
  0x1c   :  { %p488_p11 = scmp.ne.s32.totalorder %s19_s30, %s487_s1  ;;  %p493_p13 = scmp.lt.s32.totalorder %s487_s1, %s487_s1 }
  0x1e   :  { %p494_p0 = por %p493_p13, %p492_p12 }
  0x20   :  { %p495_p1 = pnand %p494_p0, %p488_p11 }
  0x22   :  { %498 = shalt.err (!%p495_p1)
}
  0x23   :  { %21 = dma.hbm_to_vmem [thread:$0]  %s665_s0, 32, %s19_s30, [#allocation5]  }
  0x24   :  { %s499_s18 = scalar_lea.hbm %s667_s2, 1536 }
  0x25   :  { %p500_p2 = scmp.ne.s32.totalorder %s667_s2, %s499_s18  ;;  %p503_p3 = scmp.lt.u32.totalorder %s499_s18, %s667_s2 }
  0x27   :  { %p505_p4 = pnand %p503_p3, %p500_p2 }
  0x29   :  { %508 = shalt.err (!%p505_p4)
}
  0x2a   :  { %s509_s23 = scalar_lea.vmem %s40_s6, 1536  ;;  %p514_p6 = scmp.lt.s32.totalorder %s40_s6, %s40_s6 }
  0x2b   :  { %p510_p5 = scmp.ne.s32.totalorder %s40_s6, %s509_s23  ;;  %p515_p7 = scmp.lt.s32.totalorder %s509_s23, %s509_s23 }
  0x2d   :  { %p516_p8 = por %p515_p7, %p514_p6 }
  0x2f   :  { %p517_p9 = pnand %p516_p8, %p510_p5 }
  0x31   :  { %520 = shalt.err (!%p517_p9)
}
  0x32   :  { %45 = dma.hbm_to_vmem [thread:$0]  %s667_s2, 1536, %s40_s6, [#allocation8], %s550_s25, %s550_s25, %s551_s26  }
  0x33   :  { %543 = dma.done.wait [#allocation5], 32  }
  0x34   :  { %544 = vsyncadd [#allocation5], 4294967264 }
  0x35   :  { %545 = dma.done.wait [#allocation8], 1792  }
  0x36   :  { %546 = vsyncadd [#allocation8], 4294965504  ;;  %vm61_vm0 = vcmask 254976   ;;  %v554_v0 = vmov 0.0|0.0   ;;  %v555_v1 = vmov 0.0   ;;  %v556_v2 = vmov -inf  }
  0x37   :  { %427 = vmatprep.subr.bf16.mxu0 %v554_v0  ;;  %433 = vmatprep.subr.bf16.mxu1 %v554_v0  ;;  %62 = vst.msk [vmem:[#allocation2] sm:$0x3] %vm61_vm0, %v555_v1  ;;  %63 = vst.msk [vmem:[#allocation3] sm:$0x3] %vm61_vm0, %v556_v2  ;;  %vm557_vm1 = vmmov 0   ;;  %v121_v3 = vld [vmem:[#allocation9 + $0x20] sm:$0xff] }
  0x38   :  { %402 = vmatprep.mubr.msk.f32.mxu0 %vm557_vm1, %v555_v1  ;;  %413 = vmatprep.mubr.msk.f32.mxu1 %vm557_vm1, %v555_v1  ;;  %v122_v4 = vld [vmem:[#allocation9 + $0x28] sm:$0xff]  ;;  %v115_v5 = vld [vmem:[#allocation9] sm:$0xff]  ;;  %vm67_vm2 = vcmask 261120   ;;  %v123_v8 = vld [vmem:[#allocation9 + $0x30] sm:$0xff]  ;;  %vm84_vm3 = vcmask 1041409   ;;  %s558_s26 = smov [#allocation10]  }
  0x39   :  { %v428_v6 = vpack.c.bf16 %v122_v4, %v121_v3  ;;  %v116_v7 = vld [vmem:[#allocation9 + $0x8] sm:$0xff]  ;;  %v124_v9 = vld [vmem:[#allocation9 + $0x38] sm:$0xff]  ;;  %v117_v11 = vld [vmem:[#allocation9 + $0x10] sm:$0xff]  ;;  %s365_s27 = sshll.u32 %s558_s26, 4  ;;  %s366_s27 = int_to_ptr.vmem [resolvable:$true] %s365_s27 }
  0x3a   :  { %v434_v10 = vpack.c.bf16 %v116_v7, %v115_v5  ;;  %v118_v12 = vld [vmem:[#allocation9 + $0x18] sm:$0xff]  ;;  %v64_v13 = vld [vmem:[#allocation7] sm:$0xff]  ;;  %v431_v14 = vpack.c.bf16 %v124_v9, %v123_v8  ;;  %v114_v30 = vld [vmem:[#allocation4] sm:$0x3]  ;;  %s521_s28 = scalar_lea.vmem %s366_s27, 32  ;;  %p526_p11 = scmp.lt.s32.totalorder %s366_s27, %s366_s27 }
  0x3b   :  { %429 = vmatpush3.bf16.msra.mxu0 %v428_v6  ;;  %v437_v15 = vpack.c.bf16 %v118_v12, %v117_v11  ;;  %v65_v16 = vld [vmem:[#allocation7 + $0x8] sm:$0xff]  ;;  %v68_v17 = vsel %vm67_vm2, %v64_v13, 0.0  ;;  %v91_v20 = vsel %vm67_vm2, %v64_v13, -inf  ;;  %v272_v52 = vld [vmem:[#allocation9 + $0x40] sm:$0xff]  ;;  %v273_v53 = vld [vmem:[#allocation9 + $0x48] sm:$0xff]  ;;  %p522_p10 = scmp.ne.s32.totalorder %s366_s27, %s521_s28  ;;  %p527_p12 = scmp.lt.s32.totalorder %s521_s28, %s521_s28 }
  0x3c   :  { %435 = vmatpush3.bf16.msra.mxu1 %v434_v10  ;;  %430 = vmatprep.subr.bf16.mxu0 %v554_v0  ;;  %v69_v18 = vrot.slane %v68_v17, 4  ;;  %v75_v19 = vsel %vm67_vm2, %v65_v16, 0.0  ;;  %v98_v21 = vsel %vm67_vm2, %v65_v16, -inf  ;;  %v92_v23 = vrot.slane %v91_v20, 4  ;;  %v274_v57 = vld [vmem:[#allocation9 + $0x50] sm:$0xff]  ;;  %v275_v58 = vld [vmem:[#allocation9 + $0x58] sm:$0xff] }
  0x3d   :  { %436 = vmatprep.subr.bf16.mxu1 %v554_v0  ;;  %v76_v22 = vrot.slane %v75_v19, 4  ;;  %v99_v24 = vrot.slane %v98_v21, 4  ;;  %v440_v55 = vpack.c.bf16 %v273_v53, %v272_v52  ;;  %v443_v59 = vpack.c.bf16 %v275_v58, %v274_v57  ;;  %v378_v5 = vld [vmem:[%s668_s3] ss:$0 sm:$0xff]  ;;  %p528_p13 = por %p527_p12, %p526_p11 }
  0x3e   :  { %v70_v25 = vadd.f32 %v69_v18, %v68_v17  ;;  %v93_v27 = vmax.f32 %v91_v20, %v92_v23  ;;  %v66_v43 = vld [vmem:[#allocation2] sm:$0x3]  ;;  %v90_v45 = vld [vmem:[#allocation3] sm:$0x3] }
  0x3f   :  { %432 = vmatpush3.bf16.msra.mxu0 %v431_v14  ;;  %v77_v26 = vadd.f32 %v76_v22, %v75_v19  ;;  %v100_v28 = vmax.f32 %v98_v21, %v99_v24  ;;  %p529_p0 = pnand %p528_p13, %p522_p10 }
  0x40   :  { %438 = vmatpush3.bf16.msra.mxu1 %v437_v15  ;;  %439 = vmatprep.subr.bf16.mxu0 %v554_v0  ;;  %v71_v29 = vrot.slane %v70_v25, 2  ;;  %v94_v32 = vrot.slane %v93_v27, 2 }
  0x41   :  { %v78_v31 = vrot.slane %v77_v26, 2  ;;  %v101_v33 = vrot.slane %v100_v28, 2 }
  0x42   :  { %v72_v34 = vadd.f32 %v71_v29, %v70_v25  ;;  %v95_v36 = vmax.f32 %v93_v27, %v94_v32 }
  0x43   :  { %v79_v35 = vadd.f32 %v78_v31, %v77_v26  ;;  %v102_v37 = vmax.f32 %v100_v28, %v101_v33  ;;  %414 = vmatmul.mubr.msk.f32.vlgmr.msra.gmra.mrb[0].mxu1 %vm67_vm2, %v114_v30 }
  0x44   :  { %v73_v38 = vrot.slane %v72_v34, 1  ;;  %v96_v40 = vrot.slane %v95_v36, 1 }
  0x45   :  { %v80_v39 = vrot.slane %v79_v35, 1  ;;  %v103_v41 = vrot.slane %v102_v37, 1 }
  0x46   :  { %v74_v42 = vadd.f32 %v73_v38, %v72_v34  ;;  %v97_v46 = vmax.f32 %v95_v36, %v96_v40 }
  0x47   :  { %v81_v44 = vadd.f32 %v80_v39, %v79_v35  ;;  %v104_v47 = vmax.f32 %v102_v37, %v103_v41 }
  0x49   :  { %v85_v48 = vsel %vm84_vm3, %v81_v44, %v74_v42  ;;  %v107_v49 = vsel %vm84_vm3, %v104_v47, %v97_v46 }
  0x4a   :  { %v87_v50 = vadd.f32 %v85_v48, %v66_v43  ;;  %v109_v51 = vmax.f32 %v90_v45, %v107_v49 }
  0x4c   :  { %89 = vst.msk [vmem:[#allocation2] sm:$0x3] %vm61_vm0, %v87_v50  ;;  %110 = vst.msk [vmem:[#allocation3] sm:$0x3] %vm61_vm0, %v109_v51 }
  0x53   :  { %v119_v54 = vld [vmem:[#allocation2] sm:$0x3]  ;;  %v271_v60 = vld [vmem:[#allocation3] sm:$0x3] }
  0x54   :  { %v120_v56 = vmul.f32 0.125, %v119_v54 }
  0x56   :  { %403 = vmatmul.mubr.msk.f32.vlgmr.msra.gmra.mrb[0].mxu0 %vm67_vm2, %v120_v56 }
  0x57   :  { %441 = vmatpush3.bf16.msra.mxu0 %v440_v55  ;;  %424 = vmatprep.mubr.msk.f32.mxu0 %vm557_vm1, %v555_v1 }
  0x58   :  { %442 = vmatprep.subr.bf16.mxu0 %v554_v0 }
  0x5b   :  { %444 = vmatpush3.bf16.msra.mxu0 %v443_v59 }
  0x5e   :  { %425 = vmatmul.mubr.msk.f32.vlgmr.msra.gmra.mrb[2].mxu0 %vm67_vm2, %v271_v60 }
 0x116   :  { %v267_v61 = vpop.f32.mrb[0].mxu1 }
 0x117   :  { %v415_v62 = vpop.f32.mrb[1].mxu1 }
 0x129   :  { %v194_v63 = vpop.f32.mrb[0].mxu0 }
 0x12a   :  { %v268_v2 = vadd.f32 %v267_v61, %v194_v63  ;;  %v404_v3 = vpop.f32.mrb[1].mxu0 }
 0x131   :  { %v345_v4 = vpop.f32.mrb[2].mxu0 }
 0x132   :  { %v349_v6 = vadd.f32 %v345_v4, %v268_v2  ;;  %v426_v1 = vpop.f32.mrb[3].mxu0 }
 0x134   :  { %v357_v7 = vadd.f32 %v378_v5, %v349_v6 }
 0x136   :  { %358 = vst [vmem:[#allocation10] sm:$0x3] %v357_v7 }
 0x137   :  { %532 = shalt.err (!%p529_p0)
}
 0x138   :  { %s533_s5 = scalar_lea.hbm %s669_s4, 32 }
 0x139   :  { %p534_p1 = scmp.ne.s32.totalorder %s669_s4, %s533_s5  ;;  %p537_p2 = scmp.lt.u32.totalorder %s533_s5, %s669_s4 }
 0x13b   :  { %p539_p3 = pnand %p537_p2, %p534_p1 }
 0x13d   :  { %542 = shalt.err (!%p539_p3)
}
 0x13e   :  { %368 = dma.vmem_to_hbm [thread:$0]  %s366_s27, 32, %s669_s4, [#allocation6]  }
 0x13f   :  { %547 = dma.done.wait [#allocation6], 32  }
 0x140   :  { %548 = vsyncadd [#allocation6], 4294967264 }
 0x141   :  { %372 = vsyncpa [#allocation5], 1 }
 0x142   :  { %373 = vsyncpa [#allocation8], 1 }
 0x143   :  { %374 = vsyncpa [#allocation6], 1 }

</bundles_post_ra>
